<compile_context>
chip_gen: v7x
topology: tpu7x:2x2x1
jax: 0.10.0
libtpu: 0.0.40
codegen_flags: <defaults>
</compile_context>

<pallas_src>
import jax
import jax.numpy as jnp
from jax.experimental import pallas as pl
from jax.experimental.pallas import tpu as pltpu


# ----------------------------------------------------------------------------- kernel

def critic_kernel(x_ref, w1_ref, b1_ref, w2_ref, b2_ref,
                  w3_ref, b3_ref, w4_ref, b4_ref, o_ref):
    # bf16 matmuls on the MXU with f32 accumulation; bias add + ReLU on the VPU.
    h = jnp.dot(x_ref[...], w1_ref[...], preferred_element_type=jnp.float32) + b1_ref[...]
    h = jnp.maximum(h, 0.0).astype(jnp.bfloat16)
    h = jnp.dot(h, w2_ref[...], preferred_element_type=jnp.float32) + b2_ref[...]
    h = jnp.maximum(h, 0.0).astype(jnp.bfloat16)
    h = jnp.dot(h, w3_ref[...], preferred_element_type=jnp.float32) + b3_ref[...]
    h = jnp.maximum(h, 0.0).astype(jnp.bfloat16)
    out = jnp.dot(h, w4_ref[...], preferred_element_type=jnp.float32) + b4_ref[...]
    o_ref[...] = out.astype(o_ref.dtype)


# ----------------------------------------------------------------------------- helpers

def _round_up(n, m):
    return ((n + m - 1) // m) * m


def _num_tensorcores():
    """Best-effort TensorCore count per chip (v7x=2, v5e/v6e=1). Defaults to 1."""
    try:
        info = pltpu.get_tpu_info()
        for attr in ("num_tensorcores", "tensorcores_per_chip", "num_cores", "core_count"):
            v = getattr(info, attr, None)
            if isinstance(v, int) and v > 0:
                return v
    except Exception:
        pass
    return 1


def init_params(key, obs_dim, actions_dim):
    """Deterministic init mimicking PyTorch nn.Linear default: U(-1/sqrt(fan_in), ...)."""
    dims = [
        ("w1", "b1", obs_dim, 512),      # input_layer
        ("w2", "b2", 512, 256),          # fc1
        ("w3", "b3", 256, 128),          # fc2
        ("w4", "b4", 128, actions_dim),  # output_layer
    ]
    params = {}
    for wname, bname, fan_in, fan_out in dims:
        key, kw, kb = jax.random.split(key, 3)
        bound = 1.0 / jnp.sqrt(jnp.float32(fan_in))
        params[wname] = jax.random.uniform(
            kw, (fan_in, fan_out), jnp.float32, minval=-bound, maxval=bound)
        params[bname] = jax.random.uniform(
            kb, (1, fan_out), jnp.float32, minval=-bound, maxval=bound)
    return params


def prepare_params(params):
    """One-time parameter prep (hoisted out of the hot path):
       - weights cast to bf16 (MXU-native; halves weight HBM bytes),
       - biases kept f32 (added after the f32 accumulation),
       - output head zero-padded to a multiple of 128 lanes for a lane-dense store."""
    w4, b4 = params["w4"], params["b4"]
    actions_dim = w4.shape[1]
    out_pad = _round_up(actions_dim, 128)
    if out_pad != actions_dim:
        w4 = jnp.zeros((w4.shape[0], out_pad), w4.dtype).at[:, :actions_dim].set(w4)
        b4 = jnp.zeros((1, out_pad), b4.dtype).at[:, :actions_dim].set(b4)
    return {
        "w1": params["w1"].astype(jnp.bfloat16), "b1": params["b1"].astype(jnp.float32),
        "w2": params["w2"].astype(jnp.bfloat16), "b2": params["b2"].astype(jnp.float32),
        "w3": params["w3"].astype(jnp.bfloat16), "b3": params["b3"].astype(jnp.float32),
        "w4": w4.astype(jnp.bfloat16),           "b4": b4.astype(jnp.float32),
    }


# ----------------------------------------------------------------------------- forward

def critic_forward(x, prepped, actions_dim, *, max_batch_tile=1024, num_tensorcores=None):
    """x: (B, obs_dim) float32. prepped: output of prepare_params(). Returns (B, actions_dim) f32."""
    B, obs_dim = x.shape
    w1, b1 = prepped["w1"], prepped["b1"]
    w2, b2 = prepped["w2"], prepped["b2"]
    w3, b3 = prepped["w3"], prepped["b3"]
    w4, b4 = prepped["w4"], prepped["b4"]
    out_pad = w4.shape[1]

    if num_tensorcores is None:
        num_tensorcores = _num_tensorcores()

    # Batch tiling: 16-row granularity (bf16 sublane packing), large tiles to amortize
    # ~0.35 us per-grid-step overhead.
    batch_tile = min(_round_up(max_batch_tile, 16), _round_up(B, 16))
    num_tiles = pl.cdiv(B, batch_tile)
    # Only shard across TensorCores (v7x) when each core gets >=256 rows, so the
    # duplicated weight fetch + extra grid step is amortized. On 1-TC chips the grid
    # is a sequential loop and splitting is pure overhead.
    if num_tensorcores >= 2 and num_tiles == 1 and B >= 512:
        batch_tile = _round_up((batch_tile + 1) // 2, 16)
        num_tiles = pl.cdiv(B, batch_tile)

    B_pad = num_tiles * batch_tile
    x_in = x.astype(jnp.bfloat16)
    if B_pad != B:
        # Only the ragged tail tile needs padding; single pad op, sliced off below.
        x_in = jnp.pad(x_in, ((0, B_pad - B), (0, 0)))

    grid = (num_tiles,)

    def full_spec(shape):
        # Whole (small) parameter resident in VMEM for every grid step.
        return pl.BlockSpec(shape, lambda i: (0,) * len(shape))

    # Advisory cost estimate so XLA schedules this small custom call tightly.
    flops = 2 * B_pad * (obs_dim * 512 + 512 * 256 + 256 * 128 + 128 * out_pad)
    bytes_accessed = (2 * (x_in.size + w1.size + w2.size + w3.size + w4.size)
                      + 4 * (b1.size + b2.size + b3.size + b4.size + B_pad * out_pad))

    out = pl.pallas_call(
        critic_kernel,
        out_shape=jax.ShapeDtypeStruct((B_pad, out_pad), jnp.float32),
        grid_spec=pltpu.PrefetchScalarGridSpec(
            num_scalar_prefetch=0,
            grid=grid,
            in_specs=[
                pl.BlockSpec((batch_tile, obs_dim), lambda i: (i, 0)),  # x tile
                full_spec(w1.shape), full_spec(b1.shape),
                full_spec(w2.shape), full_spec(b2.shape),
                full_spec(w3.shape), full_spec(b3.shape),
                full_spec(w4.shape), full_spec(b4.shape),
            ],
            out_specs=pl.BlockSpec((batch_tile, out_pad), lambda i: (i, 0)),
        ),
        compiler_params=pltpu.CompilerParams(
            dimension_semantics=("parallel",),
        ),
        cost_estimate=pl.CostEstimate(
            flops=flops, transcendentals=0, bytes_accessed=bytes_accessed),
    )(x_in, w1, b1, w2, b2, w3, b3, w4, b4)

    # Slice off batch padding and the zero-padded output lanes.
    return out[:B, :actions_dim]


def critic_reference(x, p):
    h = jnp.maximum(x @ p["w1"] + p["b1"], 0.0)
    h = jnp.maximum(h @ p["w2"] + p["b2"], 0.0)
    h = jnp.maximum(h @ p["w3"] + p["b3"], 0.0)
    return h @ p["w4"] + p["b4"]


if __name__ == "__main__":
    key = jax.random.PRNGKey(0)
    k_params, k_x = jax.random.split(key)

    B = 12           # batch (deliberately not a multiple of 16 -> exercises padding path)
    obs_dim = 32     # observations_dim
    actions_dim = 6  # actions_dim (critic head width; exercises lane-padded output)

    params = init_params(k_params, obs_dim, actions_dim)
    prepped = prepare_params(params)          # one-time: bf16 cast + lane-padded head
    x = jax.random.normal(k_x, (B, obs_dim), dtype=jnp.float32)

    out = critic_forward(x, prepped, actions_dim)
    out = jax.block_until_ready(out)

    ref = critic_reference(x, params)         # f32 reference
    assert out.shape == (B, actions_dim), f"bad shape {out.shape}"
    # bf16 matmuls (f32 accumulation) -> loosened tolerance vs f32 reference.
    assert jnp.allclose(out, ref, atol=5e-2, rtol=5e-2), "mismatch vs JAX reference"

    print("KERNEL_OK")
</pallas_src>

<mosaic_0001>
module attributes {stable_mosaic.version = 11 : i64} {
  func.func @critic_kernel(%arg0: i32, %arg1: memref<16x32xbf16, #tpu.memory_space<vmem>>, %arg2: memref<32x512xbf16, #tpu.memory_space<vmem>>, %arg3: memref<1x512xf32, #tpu.memory_space<vmem>>, %arg4: memref<512x256xbf16, #tpu.memory_space<vmem>>, %arg5: memref<1x256xf32, #tpu.memory_space<vmem>>, %arg6: memref<256x128xbf16, #tpu.memory_space<vmem>>, %arg7: memref<1x128xf32, #tpu.memory_space<vmem>>, %arg8: memref<128x128xbf16, #tpu.memory_space<vmem>>, %arg9: memref<1x128xf32, #tpu.memory_space<vmem>>, %arg10: memref<16x128xf32, #tpu.memory_space<vmem>>) attributes {dimension_semantics = [#tpu.dimension_semantics<parallel>], iteration_bounds = array<i64: 1>, scalar_prefetch = 0 : i64, scratch_operands = 0 : i64, tpu.core_type = #tpu.core_type<tc>, window_params = [{transform_indices = @transform_0, window_bounds = array<i64: 16, 32>}, {pipeline_mode = #tpu.pipeline_mode<synchronous>, transform_indices = @transform_1, window_bounds = array<i64: 32, 512>}, {pipeline_mode = #tpu.pipeline_mode<synchronous>, transform_indices = @transform_2, window_bounds = array<i64: 1, 512>}, {pipeline_mode = #tpu.pipeline_mode<synchronous>, transform_indices = @transform_3, window_bounds = array<i64: 512, 256>}, {pipeline_mode = #tpu.pipeline_mode<synchronous>, transform_indices = @transform_4, window_bounds = array<i64: 1, 256>}, {pipeline_mode = #tpu.pipeline_mode<synchronous>, transform_indices = @transform_5, window_bounds = array<i64: 256, 128>}, {pipeline_mode = #tpu.pipeline_mode<synchronous>, transform_indices = @transform_6, window_bounds = array<i64: 1, 128>}, {pipeline_mode = #tpu.pipeline_mode<synchronous>, transform_indices = @transform_7, window_bounds = array<i64: 128, 128>}, {pipeline_mode = #tpu.pipeline_mode<synchronous>, transform_indices = @transform_8, window_bounds = array<i64: 1, 128>}, {transform_indices = @transform_9, window_bounds = array<i64: 16, 128>}]} {
    %c0 = arith.constant 0 : index
    %c0_0 = arith.constant 0 : index
    %0 = vector.load %arg1[%c0, %c0_0] : memref<16x32xbf16, #tpu.memory_space<vmem>>, vector<16x32xbf16>
    %c0_1 = arith.constant 0 : index
    %c0_2 = arith.constant 0 : index
    %1 = vector.load %arg2[%c0_1, %c0_2] : memref<32x512xbf16, #tpu.memory_space<vmem>>, vector<32x512xbf16>
    %cst = arith.constant dense<0.000000e+00> : vector<16x512xf32>
    %2 = tpu.matmul %0, %1, %cst {dimension_numbers = #tpu.dot_dimension_numbers<[1], [0], [0], [1], [0, 0, 1, 1], [], []>} : vector<16x32xbf16>, vector<32x512xbf16>, vector<16x512xf32> -> vector<16x512xf32>
    %c0_3 = arith.constant 0 : index
    %c0_4 = arith.constant 0 : index
    %3 = vector.load %arg3[%c0_3, %c0_4] : memref<1x512xf32, #tpu.memory_space<vmem>>, vector<1x512xf32>
    %4 = vector.broadcast %3 : vector<1x512xf32> to vector<16x512xf32>
    %5 = arith.addf %2, %4 : vector<16x512xf32>
    %cst_5 = arith.constant 0.000000e+00 : f32
    %6 = vector.broadcast %cst_5 : f32 to vector<16x512xf32>
    %7 = arith.maximumf %5, %6 : vector<16x512xf32>
    %8 = arith.truncf %7 : vector<16x512xf32> to vector<16x512xbf16>
    %c0_6 = arith.constant 0 : index
    %c0_7 = arith.constant 0 : index
    %9 = vector.load %arg4[%c0_6, %c0_7] : memref<512x256xbf16, #tpu.memory_space<vmem>>, vector<512x256xbf16>
    %cst_8 = arith.constant dense<0.000000e+00> : vector<16x256xf32>
    %10 = tpu.matmul %8, %9, %cst_8 {dimension_numbers = #tpu.dot_dimension_numbers<[1], [0], [0], [1], [0, 0, 1, 1], [], []>} : vector<16x512xbf16>, vector<512x256xbf16>, vector<16x256xf32> -> vector<16x256xf32>
    %c0_9 = arith.constant 0 : index
    %c0_10 = arith.constant 0 : index
    %11 = vector.load %arg5[%c0_9, %c0_10] : memref<1x256xf32, #tpu.memory_space<vmem>>, vector<1x256xf32>
    %12 = vector.broadcast %11 : vector<1x256xf32> to vector<16x256xf32>
    %13 = arith.addf %10, %12 : vector<16x256xf32>
    %cst_11 = arith.constant 0.000000e+00 : f32
    %14 = vector.broadcast %cst_11 : f32 to vector<16x256xf32>
    %15 = arith.maximumf %13, %14 : vector<16x256xf32>
    %16 = arith.truncf %15 : vector<16x256xf32> to vector<16x256xbf16>
    %c0_12 = arith.constant 0 : index
    %c0_13 = arith.constant 0 : index
    %17 = vector.load %arg6[%c0_12, %c0_13] : memref<256x128xbf16, #tpu.memory_space<vmem>>, vector<256x128xbf16>
    %cst_14 = arith.constant dense<0.000000e+00> : vector<16x128xf32>
    %18 = tpu.matmul %16, %17, %cst_14 {dimension_numbers = #tpu.dot_dimension_numbers<[1], [0], [0], [1], [0, 0, 1, 1], [], []>} : vector<16x256xbf16>, vector<256x128xbf16>, vector<16x128xf32> -> vector<16x128xf32>
    %c0_15 = arith.constant 0 : index
    %c0_16 = arith.constant 0 : index
    %19 = vector.load %arg7[%c0_15, %c0_16] : memref<1x128xf32, #tpu.memory_space<vmem>>, vector<1x128xf32>
    %20 = vector.broadcast %19 : vector<1x128xf32> to vector<16x128xf32>
    %21 = arith.addf %18, %20 : vector<16x128xf32>
    %cst_17 = arith.constant 0.000000e+00 : f32
    %22 = vector.broadcast %cst_17 : f32 to vector<16x128xf32>
    %23 = arith.maximumf %21, %22 : vector<16x128xf32>
    %24 = arith.truncf %23 : vector<16x128xf32> to vector<16x128xbf16>
    %c0_18 = arith.constant 0 : index
    %c0_19 = arith.constant 0 : index
    %25 = vector.load %arg8[%c0_18, %c0_19] : memref<128x128xbf16, #tpu.memory_space<vmem>>, vector<128x128xbf16>
    %cst_20 = arith.constant dense<0.000000e+00> : vector<16x128xf32>
    %26 = tpu.matmul %24, %25, %cst_20 {dimension_numbers = #tpu.dot_dimension_numbers<[1], [0], [0], [1], [0, 0, 1, 1], [], []>} : vector<16x128xbf16>, vector<128x128xbf16>, vector<16x128xf32> -> vector<16x128xf32>
    %c0_21 = arith.constant 0 : index
    %c0_22 = arith.constant 0 : index
    %27 = vector.load %arg9[%c0_21, %c0_22] : memref<1x128xf32, #tpu.memory_space<vmem>>, vector<1x128xf32>
    %28 = vector.broadcast %27 : vector<1x128xf32> to vector<16x128xf32>
    %29 = arith.addf %26, %28 : vector<16x128xf32>
    %c0_23 = arith.constant 0 : index
    %c0_24 = arith.constant 0 : index
    %30 = vector.load %arg10[%c0_23, %c0_24] : memref<16x128xf32, #tpu.memory_space<vmem>>, vector<16x128xf32>
    tpu.vector_store %arg10[%c0_23, %c0_24], %29 {strides = array<i32>} : memref<16x128xf32, #tpu.memory_space<vmem>>, vector<16x128xf32>,
    return
  }
  func.func @transform_0(%arg0: i32) -> (i32, i32) {
    %c0_i32 = arith.constant 0 : i32
    %c0_i32_0 = arith.constant 0 : i32
    return %arg0, %c0_i32 : i32, i32
  }
  func.func @transform_1(%arg0: i32) -> (i32, i32) {
    %c0_i32 = arith.constant 0 : i32
    %c0_i32_0 = arith.constant 0 : i32
    %c0_i32_1 = arith.constant 0 : i32
    return %c0_i32, %c0_i32_0 : i32, i32
  }
  func.func @transform_2(%arg0: i32) -> (i32, i32) {
    %c0_i32 = arith.constant 0 : i32
    %c0_i32_0 = arith.constant 0 : i32
    %c0_i32_1 = arith.constant 0 : i32
    return %c0_i32, %c0_i32_0 : i32, i32
  }
  func.func @transform_3(%arg0: i32) -> (i32, i32) {
    %c0_i32 = arith.constant 0 : i32
    %c0_i32_0 = arith.constant 0 : i32
    %c0_i32_1 = arith.constant 0 : i32
    return %c0_i32, %c0_i32_0 : i32, i32
  }
  func.func @transform_4(%arg0: i32) -> (i32, i32) {
    %c0_i32 = arith.constant 0 : i32
    %c0_i32_0 = arith.constant 0 : i32
    %c0_i32_1 = arith.constant 0 : i32
    return %c0_i32, %c0_i32_0 : i32, i32
  }
  func.func @transform_5(%arg0: i32) -> (i32, i32) {
    %c0_i32 = arith.constant 0 : i32
    %c0_i32_0 = arith.constant 0 : i32
    %c0_i32_1 = arith.constant 0 : i32
    return %c0_i32, %c0_i32_0 : i32, i32
  }
  func.func @transform_6(%arg0: i32) -> (i32, i32) {
    %c0_i32 = arith.constant 0 : i32
    %c0_i32_0 = arith.constant 0 : i32
    %c0_i32_1 = arith.constant 0 : i32
    return %c0_i32, %c0_i32_0 : i32, i32
  }
  func.func @transform_7(%arg0: i32) -> (i32, i32) {
    %c0_i32 = arith.constant 0 : i32
    %c0_i32_0 = arith.constant 0 : i32
    %c0_i32_1 = arith.constant 0 : i32
    return %c0_i32, %c0_i32_0 : i32, i32
  }
  func.func @transform_8(%arg0: i32) -> (i32, i32) {
    %c0_i32 = arith.constant 0 : i32
    %c0_i32_0 = arith.constant 0 : i32
    %c0_i32_1 = arith.constant 0 : i32
    return %c0_i32, %c0_i32_0 : i32, i32
  }
  func.func @transform_9(%arg0: i32) -> (i32, i32) {
    %c0_i32 = arith.constant 0 : i32
    %c0_i32_0 = arith.constant 0 : i32
    return %arg0, %c0_i32 : i32, i32
  }
}

</mosaic_0001>

<bundles_post_ra>
// kernel: tpu_custom_call.1
= control target key start
LH: loop header
LB: loop body
LE: loop exit
PB: predicated region body
PF: predicated region fallthrough
CT: control target
= control target key end

     0   :  { %14 = vsyncpa [#allocation3], 0  ;;  %s1709_s0 = inlined_call_operand.hbm [shape: bf16[16,32], index: 0, kind: input, shape index: {}]   ;;  %s1710_s1 = inlined_call_operand.hbm [shape: bf16[32,512], index: 1, kind: input, shape index: {}]   ;;  %s1711_s2 = inlined_call_operand.vmem [shape: f32[1,512], index: 2, kind: input, shape index: {}]   ;;  %s1712_s3 = inlined_call_operand.hbm [shape: bf16[512,256], index: 3, kind: input, shape index: {}]   ;;  %s1713_s4 = inlined_call_operand.vmem [shape: f32[1,256], index: 4, kind: input, shape index: {}]   ;;  %s1714_s5 = inlined_call_operand.hbm [shape: bf16[256,128], index: 5, kind: input, shape index: {}]   ;;  %s1715_s6 = inlined_call_operand.vmem [shape: f32[1,128], index: 6, kind: input, shape index: {}]   ;;  %s1716_s7 = inlined_call_operand.hbm [shape: bf16[128,128], index: 7, kind: input, shape index: {}]   ;;  %s1717_s8 = inlined_call_operand.vmem [shape: f32[1,128], index: 8, kind: input, shape index: {}]   ;;  %s1718_s9 = inlined_call_operand.hbm [shape: f32[16,128], index: 9, kind: output, shape index: {}]  }
   0x1   :  { %15 = vsyncpa [#allocation6], 0 }
   0x2   :  { %16 = vsyncpa [#allocation9], 0 }
   0x3   :  { %17 = vsyncpa [#allocation4], 0  ;;  %s1529_s30 = smov [#allocation5]   ;;  %s1389_s13 = scalar_lea.hbm %s1710_s1, 1024 }
   0x4   :  { %s35_s10 = sshll.u32 %s1529_s30, 4  ;;  %p1390_p0 = scmp.ne.s32.totalorder %s1710_s1, %s1389_s13  ;;  %s36_s10 = int_to_ptr.vmem [resolvable:$true] %s35_s10 }
   0x5   :  { %p1393_p1 = scmp.lt.u32.totalorder %s1389_s13, %s1710_s1 }
   0x7   :  { %p1395_p2 = pnand %p1393_p1, %p1390_p0 }
   0x9   :  { %1398 = shalt.err (!%p1395_p2)
}
   0xa   :  { %s1399_s18 = scalar_lea.vmem %s36_s10, 1024  ;;  %p1404_p4 = scmp.lt.s32.totalorder %s36_s10, %s36_s10 }
   0xb   :  { %p1400_p3 = scmp.ne.s32.totalorder %s36_s10, %s1399_s18  ;;  %p1405_p5 = scmp.lt.s32.totalorder %s1399_s18, %s1399_s18 }
   0xd   :  { %p1406_p6 = por %p1405_p5, %p1404_p4 }
   0xf   :  { %p1407_p7 = pnand %p1406_p6, %p1400_p3 }
  0x11   :  { %1410 = shalt.err (!%p1407_p7)
}
  0x12   :  { %s1530_s19 = smov 256   ;;  %s1531_s20 = smov 16  }
  0x13   :  { %41 = dma.hbm_to_vmem [thread:$0]  %s1710_s1, 1024, %s36_s10, [#allocation6], %s1530_s19, %s1530_s19, %s1531_s20  }
  0x14   :  { %s1532_s23 = smov [#allocation8]   ;;  %s1533_s25 = smov [#allocation2]  }
  0x15   :  { %s63_s24 = sshll.u32 %s1532_s23, 4  ;;  %s23_s26 = sshll.u32 %s1533_s25, 4  ;;  %s64_s24 = int_to_ptr.vmem [resolvable:$true] %s63_s24  ;;  %s24_s26 = int_to_ptr.vmem [resolvable:$true] %s23_s26 }
  0x16   :  { %s1411_s29 = scalar_lea.hbm %s1714_s5, 2048 }
  0x17   :  { %p1412_p8 = scmp.ne.s32.totalorder %s1714_s5, %s1411_s29  ;;  %p1415_p9 = scmp.lt.u32.totalorder %s1411_s29, %s1714_s5 }
  0x19   :  { %p1417_p10 = pnand %p1415_p9, %p1412_p8 }
  0x1b   :  { %1420 = shalt.err (!%p1417_p10)
}
  0x1c   :  { %s1421_s1 = scalar_lea.vmem %s64_s24, 2048  ;;  %p1426_p12 = scmp.lt.s32.totalorder %s64_s24, %s64_s24 }
  0x1d   :  { %p1422_p11 = scmp.ne.s32.totalorder %s64_s24, %s1421_s1  ;;  %p1427_p13 = scmp.lt.s32.totalorder %s1421_s1, %s1421_s1 }
  0x1f   :  { %p1428_p0 = por %p1427_p13, %p1426_p12 }
  0x21   :  { %p1429_p1 = pnand %p1428_p0, %p1422_p11 }
  0x23   :  { %1432 = shalt.err (!%p1429_p1)
}
  0x24   :  { %s1534_s10 = smov 64   ;;  %s1535_s14 = smov 4  }
  0x25   :  { %69 = dma.hbm_to_vmem [thread:$0]  %s1714_s5, 2048, %s64_s24, [#allocation9], %s1534_s10, %s1534_s10, %s1535_s14  }
  0x26   :  { %s1433_s19 = scalar_lea.hbm %s1709_s0, 128 }
  0x27   :  { %p1434_p2 = scmp.ne.s32.totalorder %s1709_s0, %s1433_s19  ;;  %p1437_p3 = scmp.lt.u32.totalorder %s1433_s19, %s1709_s0 }
  0x29   :  { %p1439_p4 = pnand %p1437_p3, %p1434_p2 }
  0x2b   :  { %1442 = shalt.err (!%p1439_p4)
}
  0x2c   :  { %s1443_s25 = scalar_lea.vmem %s24_s26, 128  ;;  %p1448_p6 = scmp.lt.s32.totalorder %s24_s26, %s24_s26 }
  0x2d   :  { %p1444_p5 = scmp.ne.s32.totalorder %s24_s26, %s1443_s25  ;;  %p1449_p7 = scmp.lt.s32.totalorder %s1443_s25, %s1443_s25 }
  0x2f   :  { %p1450_p8 = por %p1449_p7, %p1448_p6 }
  0x31   :  { %p1451_p9 = pnand %p1450_p8, %p1444_p5 }
  0x33   :  { %1454 = shalt.err (!%p1451_p9)
}
  0x34   :  { %29 = dma.hbm_to_vmem [thread:$0]  %s1709_s0, 128, %s24_s26, [#allocation3], %s1534_s10, %s1534_s10, %s1535_s14  }
  0x35   :  { %s1536_s27 = smov [#allocation7]   ;;  %s1455_s11 = scalar_lea.hbm %s1712_s3, 8192 }
  0x36   :  { %s49_s28 = sshll.u32 %s1536_s27, 4  ;;  %p1456_p10 = scmp.ne.s32.totalorder %s1712_s3, %s1455_s11  ;;  %s50_s28 = int_to_ptr.vmem [resolvable:$true] %s49_s28 }
  0x37   :  { %p1459_p11 = scmp.lt.u32.totalorder %s1455_s11, %s1712_s3 }
  0x39   :  { %p1461_p12 = pnand %p1459_p11, %p1456_p10 }
  0x3b   :  { %1464 = shalt.err (!%p1461_p12)
}
  0x3c   :  { %s1465_s16 = scalar_lea.vmem %s50_s28, 8192  ;;  %p1470_p0 = scmp.lt.s32.totalorder %s50_s28, %s50_s28 }
  0x3d   :  { %p1466_p13 = scmp.ne.s32.totalorder %s50_s28, %s1465_s16  ;;  %p1471_p1 = scmp.lt.s32.totalorder %s1465_s16, %s1465_s16 }
  0x3f   :  { %p1472_p2 = por %p1471_p1, %p1470_p0 }
  0x41   :  { %p1473_p3 = pnand %p1472_p2, %p1466_p13 }
  0x43   :  { %1476 = shalt.err (!%p1473_p3)
}
  0x44   :  { %s1537_s0 = smov 128   ;;  %s1538_s26 = smov 8  }
  0x45   :  { %55 = dma.hbm_to_vmem [thread:$0]  %s1712_s3, 8192, %s50_s28, [#allocation6], %s1537_s0, %s1537_s0, %s1538_s26  }
  0x46   :  { %s1539_s19 = smov [#allocation10]   ;;  %s1477_s23 = scalar_lea.hbm %s1716_s7, 1024 }
  0x47   :  { %s77_s20 = sshll.u32 %s1539_s19, 4  ;;  %p1478_p4 = scmp.ne.s32.totalorder %s1716_s7, %s1477_s23  ;;  %s78_s20 = int_to_ptr.vmem [resolvable:$true] %s77_s20 }
  0x48   :  { %p1481_p5 = scmp.lt.u32.totalorder %s1477_s23, %s1716_s7 }
  0x4a   :  { %p1483_p6 = pnand %p1481_p5, %p1478_p4 }
  0x4c   :  { %1486 = shalt.err (!%p1483_p6)
}
  0x4d   :  { %s1487_s29 = scalar_lea.vmem %s78_s20, 1024  ;;  %p1492_p8 = scmp.lt.s32.totalorder %s78_s20, %s78_s20 }
  0x4e   :  { %p1488_p7 = scmp.ne.s32.totalorder %s78_s20, %s1487_s29  ;;  %p1493_p9 = scmp.lt.s32.totalorder %s1487_s29, %s1487_s29 }
  0x50   :  { %p1494_p10 = por %p1493_p9, %p1492_p8 }
  0x52   :  { %p1495_p11 = pnand %p1494_p10, %p1488_p7 }
  0x54   :  { %1498 = shalt.err (!%p1495_p11)
}
  0x55   :  { %83 = dma.hbm_to_vmem [thread:$0]  %s1716_s7, 1024, %s78_s20, [#allocation9], %s1534_s10, %s1534_s10, %s1535_s14  }
  0x56   :  { %1521 = dma.done.wait [#allocation3], 128  }
  0x57   :  { %1522 = vsyncadd [#allocation3], 4294967168 }
  0x58   :  { %1523 = dma.done.wait [#allocation6], 9216  }
  0x59   :  { %1524 = vsyncadd [#allocation6], 4294958080 }
  0x5a   :  { %1525 = dma.done.wait [#allocation9], 3072  }
  0x5b   :  { %1526 = vsyncadd [#allocation9], 4294964224  ;;  %v1540_v0 = vmov 0   ;;  %v1256_v1 = vld [vmem:[#allocation5 + $0x4] ss:$16 sps:$4 sm:$0xff]   ;;  %v1262_v6 = vld [vmem:[#allocation2] sm:$0xff]   ;;  %v114_v54 = vlaneseq }
  0x5c   :  { %215 = vmatprep.mubr.bf16.mxu1 %v1540_v0  ;;  %v1258_v2 = vld [vmem:[#allocation5] ss:$16 sps:$4 sm:$0xff]   ;;  %183 = vmatprep.subr.bf16.mxu1 %v1256_v1  ;;  %v1259_v3 = vld [vmem:[#allocation5 + $0x24] ss:$16 sps:$4 sm:$0xff]   ;;  %v1265_v5 = vld [vmem:[#allocation5 + $0xc] ss:$16 sps:$4 sm:$0xff]  }
  0x5d   :  { %184 = vmatpush1.bf16.msra.mxu1 %v1258_v2  ;;  %v1261_v4 = vld [vmem:[#allocation5 + $0x20] ss:$16 sps:$4 sm:$0xff]   ;;  %v1263_v7 = vld [vmem:[#allocation5 + $0x8] ss:$16 sps:$4 sm:$0xff]   ;;  %vm179_vm0 = vcmask 261120   ;;  %v1668_v55 = vshrl.u32 %v114_v54, 7 }
  0x5e   :  { %185 = vmatprep.subr.bf16.mxu1 %v1259_v3  ;;  %v1269_v8 = vld [vmem:[#allocation7 + $0x4] ss:$8 sps:$4 sm:$0xff]   ;;  %v1271_v9 = vld [vmem:[#allocation7] ss:$8 sps:$4 sm:$0xff]   ;;  %v1272_v11 = vld [vmem:[#allocation7 + $0x14] ss:$8 sps:$4 sm:$0xff]  }
  0x5f   :  { %v1268_v10 = vld [vmem:[#allocation5 + $0x2c] ss:$16 sps:$4 sm:$0xff]   ;;  %677 = vmatprep.subr.bf16.mxu0 %v1269_v8  ;;  %v1274_v12 = vld [vmem:[#allocation7 + $0x10] ss:$8 sps:$4 sm:$0xff]   ;;  %v1277_v15 = vld [vmem:[#allocation7 + $0x20] ss:$8 sps:$4 sm:$0xff]  }
  0x60   :  { %678 = vmatpush1.bf16.msra.mxu0 %v1271_v9  ;;  %v1266_v13 = vld [vmem:[#allocation5 + $0x28] ss:$16 sps:$4 sm:$0xff]   ;;  %v1275_v14 = vld [vmem:[#allocation7 + $0x24] ss:$8 sps:$4 sm:$0xff]   ;;  %v1278_v16 = vld [vmem:[#allocation7 + $0x34] ss:$8 sps:$4 sm:$0xff]  }
  0x61   :  { %186 = vmatpush1.bf16.msra.mxu1 %v1261_v4  ;;  %679 = vmatprep.subr.bf16.mxu0 %v1272_v11  ;;  %v1280_v17 = vld [vmem:[#allocation7 + $0x30] ss:$8 sps:$4 sm:$0xff]   ;;  %v1281_v18 = vld [vmem:[#allocation7 + $0x44] ss:$8 sps:$4 sm:$0xff]   ;;  %v1283_v19 = vld [vmem:[#allocation7 + $0x40] ss:$8 sps:$4 sm:$0xff]  }
  0x62   :  { %226 = vmatprep.subr.bf16.mxu1 %v1265_v5  ;;  %v1284_v20 = vld [vmem:[#allocation7 + $0x54] ss:$8 sps:$4 sm:$0xff]   ;;  %v1286_v21 = vld [vmem:[#allocation7 + $0x50] ss:$8 sps:$4 sm:$0xff]   ;;  %v1287_v22 = vld [vmem:[#allocation7 + $0x64] ss:$8 sps:$4 sm:$0xff]  }
  0x63   :  { %v1289_v23 = vld [vmem:[#allocation7 + $0x60] ss:$8 sps:$4 sm:$0xff]   ;;  %v1290_v24 = vld [vmem:[#allocation7 + $0x74] ss:$8 sps:$4 sm:$0xff]   ;;  %v1292_v25 = vld [vmem:[#allocation7 + $0x70] ss:$8 sps:$4 sm:$0xff]  }
  0x64   :  { %1090 = vmatmul.mubr.msk.bf16.vlgmr.msra.gmra.mrb[0].mxu1 %vm179_vm0, %v1262_v6  ;;  %680 = vmatpush1.bf16.msra.mxu0 %v1274_v12  ;;  %v1293_v26 = vld [vmem:[#allocation7 + $0x84] ss:$8 sps:$4 sm:$0xff]   ;;  %v1295_v27 = vld [vmem:[#allocation7 + $0x80] ss:$8 sps:$4 sm:$0xff]   ;;  %v1296_v28 = vld [vmem:[#allocation7 + $0x94] ss:$8 sps:$4 sm:$0xff]  }
  0x65   :  { %227 = vmatpush1.bf16.msra.mxu1 %v1263_v7  ;;  %258 = vmatprep.mubr.bf16.mxu1 %v1540_v0  ;;  %v1298_v29 = vld [vmem:[#allocation7 + $0x90] ss:$8 sps:$4 sm:$0xff]   ;;  %v1299_v30 = vld [vmem:[#allocation7 + $0xa4] ss:$8 sps:$4 sm:$0xff]   ;;  %v1301_v31 = vld [vmem:[#allocation7 + $0xa0] ss:$8 sps:$4 sm:$0xff]  }
  0x66   :  { %228 = vmatprep.subr.bf16.mxu1 %v1268_v10  ;;  %681 = vmatprep.subr.bf16.mxu0 %v1275_v14  ;;  %v1302_v32 = vld [vmem:[#allocation7 + $0xb4] ss:$8 sps:$4 sm:$0xff]   ;;  %v1304_v33 = vld [vmem:[#allocation7 + $0xb0] ss:$8 sps:$4 sm:$0xff]   ;;  %v1305_v34 = vld [vmem:[#allocation7 + $0xc4] ss:$8 sps:$4 sm:$0xff]  }
  0x67   :  { %v1307_v35 = vld [vmem:[#allocation7 + $0xc0] ss:$8 sps:$4 sm:$0xff]   ;;  %v1308_v36 = vld [vmem:[#allocation7 + $0xd4] ss:$8 sps:$4 sm:$0xff]   ;;  %v1310_v37 = vld [vmem:[#allocation7 + $0xd0] ss:$8 sps:$4 sm:$0xff]  }
  0x68   :  { %682 = vmatpush1.bf16.msra.mxu0 %v1277_v15  ;;  %v1311_v38 = vld [vmem:[#allocation7 + $0xe4] ss:$8 sps:$4 sm:$0xff]   ;;  %v1313_v39 = vld [vmem:[#allocation7 + $0xe0] ss:$8 sps:$4 sm:$0xff]   ;;  %v1314_v40 = vld [vmem:[#allocation7 + $0xf4] ss:$8 sps:$4 sm:$0xff]  }
  0x69   :  { %229 = vmatpush1.bf16.msra.mxu1 %v1266_v13  ;;  %683 = vmatprep.subr.bf16.mxu0 %v1278_v16  ;;  %v1316_v41 = vld [vmem:[#allocation7 + $0xf0] ss:$8 sps:$4 sm:$0xff]   ;;  %v1319_v42 = vld [vmem:[#allocation7 + $0x104] ss:$8 sps:$4 sm:$0xff]   ;;  %v116_v56 = vsub.s32 0, %v1668_v55  ;;  %v120_v58 = vsub.s32 1, %v1668_v55 }
  0x6a   :  { %v1365_v43 = vld [vmem:[#allocation8 + $0x40] sm:$0xff]   ;;  %v1367_v45 = vld [vmem:[#allocation8 + $0x48] sm:$0xff]   ;;  %v1369_v47 = vld [vmem:[#allocation8 + $0x50] sm:$0xff]   ;;  %v124_v0 = vsub.s32 2, %v1668_v55  ;;  %v128_v3 = vsub.s32 3, %v1668_v55  ;;  %vm1542_vm1 = vmmov 0  }
  0x6b   :  { %v1366_v44 = vld [vmem:[#allocation8] sm:$0xff]   ;;  %1182 = vmatprep.subr.bf16.mxu1 %v1365_v43  ;;  %v1368_v46 = vld [vmem:[#allocation8 + $0x8] sm:$0xff]   ;;  %v1370_v48 = vld [vmem:[#allocation8 + $0x10] sm:$0xff]   ;;  %s1543_s13 = smov [#allocation11]  }
  0x6c   :  { %1091 = vmatmul.mubr.msk.bf16.vlgmr.msra.gmra.mrb[4].mxu1 %vm179_vm0, %v1262_v6  ;;  %684 = vmatpush1.bf16.msra.mxu0 %v1280_v17  ;;  %v1371_v49 = vld [vmem:[#allocation8 + $0x58] sm:$0xff]   ;;  %v1373_v51 = vld [vmem:[#allocation8 + $0x60] sm:$0xff]   ;;  %v1375_v53 = vld [vmem:[#allocation8 + $0x68] sm:$0xff]   ;;  %s1067_s1 = sshll.u32 %s1543_s13, 4  ;;  %s1068_s1 = int_to_ptr.vmem [resolvable:$true] %s1067_s1 }
  0x6d   :  { %685 = vmatprep.subr.bf16.mxu0 %v1281_v18  ;;  %1183 = vmatpush3.bf16.msra.mxu1 %v1366_v44  ;;  %v1372_v50 = vld [vmem:[#allocation8 + $0x18] sm:$0xff]   ;;  %v1374_v52 = vld [vmem:[#allocation8 + $0x20] sm:$0xff]   ;;  %v1382_v55 = vld [vmem:[#allocation10 + $0x8] sm:$0xff]   ;;  %p1504_p13 = scmp.lt.s32.totalorder %s1068_s1, %s1068_s1 }
  0x6e   :  { %1184 = vmatprep.subr.bf16.mxu1 %v1367_v45  ;;  %v112_v57 = vld [vmem:[%s1711_s2] sm:$0xf]  ;;  %v1317_v15 = vld [vmem:[#allocation7 + $0x100] ss:$8 sps:$4 sm:$0xff]   ;;  %v1322_v17 = vld [vmem:[#allocation7 + $0x114] ss:$8 sps:$4 sm:$0xff]  }
  0x6f   :  { %v117_v59 = vrot.slane %v112_v57, %v116_v56  ;;  %v121_v60 = vrot.slane %v112_v57, %v120_v58  ;;  %v125_v9 = vrot.slane %v112_v57, %v124_v0  ;;  %v129_v12 = vrot.slane %v112_v57, %v128_v3  ;;  %v1338_v43 = vld [vmem:[#allocation7 + $0x170] ss:$8 sps:$4 sm:$0xff]   ;;  %v1343_v44 = vld [vmem:[#allocation7 + $0x184] ss:$8 sps:$4 sm:$0xff]   ;;  %v1341_v45 = vld [vmem:[#allocation7 + $0x180] ss:$8 sps:$4 sm:$0xff]  }
  0x70   :  { %686 = vmatpush1.bf16.msra.mxu0 %v1283_v19  ;;  %v1358_v54 = vld [vmem:[#allocation7 + $0x1d4] ss:$8 sps:$4 sm:$0xff]   ;;  %v1356_v57 = vld [vmem:[#allocation7 + $0x1d0] ss:$8 sps:$4 sm:$0xff]  }
  0x71   :  { %687 = vmatprep.subr.bf16.mxu0 %v1284_v20  ;;  %1185 = vmatpush3.bf16.msra.mxu1 %v1368_v46  ;;  %v1346_v46 = vld [vmem:[#allocation7 + $0x194] ss:$8 sps:$4 sm:$0xff]  }
  0x72   :  { %1186 = vmatprep.subr.bf16.mxu1 %v1369_v47  ;;  %v1344_v47 = vld [vmem:[#allocation7 + $0x190] ss:$8 sps:$4 sm:$0xff]  }
  0x73   :  { %v1377_v0 = vld [vmem:[#allocation8 + $0x70] sm:$0xff]   ;;  %v1380_v3 = vld [vmem:[#allocation8 + $0x38] sm:$0xff]  }
  0x74   :  { %688 = vmatpush1.bf16.msra.mxu0 %v1286_v21 }
  0x75   :  { %689 = vmatprep.subr.bf16.mxu0 %v1287_v22  ;;  %1187 = vmatpush3.bf16.msra.mxu1 %v1370_v48  ;;  %v1349_v48 = vld [vmem:[#allocation7 + $0x1a4] ss:$8 sps:$4 sm:$0xff]  }
  0x76   :  { %1188 = vmatprep.subr.bf16.mxu1 %v1371_v49  ;;  %v1347_v49 = vld [vmem:[#allocation7 + $0x1a0] ss:$8 sps:$4 sm:$0xff]  }
  0x78   :  { %690 = vmatpush1.bf16.msra.mxu0 %v1289_v23 }
  0x79   :  { %691 = vmatprep.subr.bf16.mxu0 %v1290_v24  ;;  %1189 = vmatpush3.bf16.msra.mxu1 %v1372_v50  ;;  %v1352_v50 = vld [vmem:[#allocation7 + $0x1b4] ss:$8 sps:$4 sm:$0xff]  }
  0x7a   :  { %1190 = vmatprep.subr.bf16.mxu1 %v1373_v51  ;;  %v1350_v51 = vld [vmem:[#allocation7 + $0x1b0] ss:$8 sps:$4 sm:$0xff]  }
  0x7c   :  { %692 = vmatpush1.bf16.msra.mxu0 %v1292_v25  ;;  %v1320_v25 = vld [vmem:[#allocation7 + $0x110] ss:$8 sps:$4 sm:$0xff]  }
  0x7d   :  { %693 = vmatprep.subr.bf16.mxu0 %v1293_v26  ;;  %1191 = vmatpush3.bf16.msra.mxu1 %v1374_v52  ;;  %v1355_v52 = vld [vmem:[#allocation7 + $0x1c4] ss:$8 sps:$4 sm:$0xff]  }
  0x7e   :  { %1192 = vmatprep.subr.bf16.mxu1 %v1375_v53  ;;  %v1353_v53 = vld [vmem:[#allocation7 + $0x1c0] ss:$8 sps:$4 sm:$0xff]  }
  0x80   :  { %694 = vmatpush1.bf16.msra.mxu0 %v1295_v27 }
  0x81   :  { %695 = vmatprep.subr.bf16.mxu0 %v1296_v28  ;;  %v1325_v28 = vld [vmem:[#allocation7 + $0x124] ss:$8 sps:$4 sm:$0xff]  }
  0x84   :  { %696 = vmatpush1.bf16.msra.mxu0 %v1298_v29 }
  0x85   :  { %697 = vmatprep.subr.bf16.mxu0 %v1299_v30 }
  0x88   :  { %698 = vmatpush1.bf16.msra.mxu0 %v1301_v31 }
  0x89   :  { %699 = vmatprep.subr.bf16.mxu0 %v1302_v32  ;;  %v1323_v32 = vld [vmem:[#allocation7 + $0x120] ss:$8 sps:$4 sm:$0xff]  }
  0x8c   :  { %700 = vmatpush1.bf16.msra.mxu0 %v1304_v33 }
  0x8d   :  { %701 = vmatprep.subr.bf16.mxu0 %v1305_v34  ;;  %v1328_v34 = vld [vmem:[#allocation7 + $0x134] ss:$8 sps:$4 sm:$0xff]  }
  0x90   :  { %702 = vmatpush1.bf16.msra.mxu0 %v1307_v35  ;;  %v1326_v35 = vld [vmem:[#allocation7 + $0x130] ss:$8 sps:$4 sm:$0xff]  }
  0x91   :  { %703 = vmatprep.subr.bf16.mxu0 %v1308_v36  ;;  %v1331_v36 = vld [vmem:[#allocation7 + $0x144] ss:$8 sps:$4 sm:$0xff]  }
  0x94   :  { %704 = vmatpush1.bf16.msra.mxu0 %v1310_v37  ;;  %v1329_v37 = vld [vmem:[#allocation7 + $0x140] ss:$8 sps:$4 sm:$0xff]  }
  0x95   :  { %705 = vmatprep.subr.bf16.mxu0 %v1311_v38  ;;  %v1334_v38 = vld [vmem:[#allocation7 + $0x154] ss:$8 sps:$4 sm:$0xff]  }
  0x98   :  { %706 = vmatpush1.bf16.msra.mxu0 %v1313_v39  ;;  %v1332_v39 = vld [vmem:[#allocation7 + $0x150] ss:$8 sps:$4 sm:$0xff]  }
  0x99   :  { %707 = vmatprep.subr.bf16.mxu0 %v1314_v40  ;;  %v1337_v40 = vld [vmem:[#allocation7 + $0x164] ss:$8 sps:$4 sm:$0xff]  }
  0x9c   :  { %708 = vmatpush1.bf16.msra.mxu0 %v1316_v41  ;;  %v1335_v41 = vld [vmem:[#allocation7 + $0x160] ss:$8 sps:$4 sm:$0xff]  }
  0x9d   :  { %720 = vmatprep.subr.bf16.mxu0 %v1319_v42  ;;  %v1340_v42 = vld [vmem:[#allocation7 + $0x174] ss:$8 sps:$4 sm:$0xff]  }
 0x137   :  { %v217_v61 = vpop.f32.mrb[0].mxu1 }
 0x138   :  { %v218_v62 = vadd.f32 %v217_v61, %v117_v59  ;;  %v219_v63 = vpop.f32.mrb[1].mxu1  ;;  %v1364_v61 = vld [vmem:[#allocation7 + $0x1f4] ss:$8 sps:$4 sm:$0xff]  }
 0x139   :  { %v220_v1 = vadd.f32 %v219_v63, %v121_v60  ;;  %v221_v2 = vpop.f32.mrb[2].mxu1  ;;  %v1376_v63 = vld [vmem:[#allocation8 + $0x28] sm:$0xff]  }
 0x13a   :  { %v222_v4 = vadd.f32 %v221_v2, %v117_v59  ;;  %v223_v5 = vpop.f32.mrb[3].mxu1  ;;  %v269_v7 = vmax.f32 %v218_v62, 0.0  ;;  %v1361_v59 = vld [vmem:[#allocation7 + $0x1e4] ss:$8 sps:$4 sm:$0xff]   ;;  %v1362_v62 = vld [vmem:[#allocation7 + $0x1f0] ss:$8 sps:$4 sm:$0xff]   ;;  %1193 = vmatpush3.bf16.msra.mxu1 %v1376_v63 }
 0x13b   :  { %v224_v6 = vadd.f32 %v223_v5, %v121_v60  ;;  %v270_v10 = vmax.f32 %v220_v1, 0.0  ;;  %v1359_v60 = vld [vmem:[#allocation7 + $0x1e0] ss:$8 sps:$4 sm:$0xff]   ;;  %v1378_v1 = vld [vmem:[#allocation8 + $0x30] sm:$0xff]   ;;  %1194 = vmatprep.subr.bf16.mxu1 %v1377_v0  ;;  %v1379_v2 = vld [vmem:[#allocation8 + $0x78] sm:$0xff]  }
 0x13c   :  { %v273_v8 = vmax.f32 %v222_v4, 0.0  ;;  %v1541_v4 = vmov 0.0   ;;  %v345_v5 = vld [vmem:[%s1713_s4] sm:$0x3] }
 0x13d   :  { %v274_v11 = vmax.f32 %v224_v6, 0.0  ;;  %v350_v6 = vrot.slane %v345_v5, %v116_v56  ;;  %v1383_v56 = vld [vmem:[#allocation10 + $0x10] sm:$0xff]  }
 0x13e   :  { %v277_v13 = vpack.c.bf16 %v273_v8, %v269_v7  ;;  %1195 = vmatpush3.bf16.msra.mxu1 %v1378_v1  ;;  %v354_v7 = vrot.slane %v345_v5, %v120_v58  ;;  %v1384_v58 = vld [vmem:[#allocation10 + $0x18] sm:$0xff]  }
 0x13f   :  { %v278_v14 = vpack.c.bf16 %v274_v11, %v270_v10  ;;  %v260_v16 = vpop.f32.mrb[4].mxu1  ;;  %1196 = vmatprep.subr.bf16.mxu1 %v1379_v2 }
 0x140   :  { %v261_v18 = vadd.f32 %v260_v16, %v125_v9  ;;  %v262_v19 = vpop.f32.mrb[5].mxu1 }
 0x141   :  { %709 = vmatprep.mubr.bf16.mxu0 %v278_v14  ;;  %v263_v20 = vadd.f32 %v262_v19, %v129_v12  ;;  %v264_v21 = vpop.f32.mrb[6].mxu1 }
 0x142   :  { %710 = vmatmul.mubr.bf16.vlgmr.msra.gmra.mrb[0].mxu0 %v277_v13  ;;  %v271_v22 = vmax.f32 %v261_v18, 0.0  ;;  %v265_v23 = vadd.f32 %v264_v21, %v125_v9  ;;  %v266_v24 = vpop.f32.mrb[7].mxu1  ;;  %1197 = vmatpush3.bf16.msra.mxu1 %v1380_v3 }
 0x143   :  { %721 = vmatpush1.bf16.msra.mxu0 %v1317_v15  ;;  %v272_v26 = vmax.f32 %v263_v20, 0.0  ;;  %v267_v27 = vadd.f32 %v266_v24, %v129_v12  ;;  %1213 = vmatprep.subr.bf16.mxu1 %v1541_v4  ;;  %v1386_v24 = vld [vmem:[#allocation10 + $0x28] sm:$0xff]  }
 0x144   :  { %722 = vmatprep.subr.bf16.mxu0 %v1322_v17  ;;  %v275_v29 = vmax.f32 %v265_v23, 0.0  ;;  %v1385_v23 = vld [vmem:[#allocation10 + $0x20] sm:$0xff]  }
 0x145   :  { %v276_v30 = vmax.f32 %v267_v27, 0.0 }
 0x146   :  { %v279_v31 = vpack.c.bf16 %v275_v29, %v271_v22  ;;  %v1381_v22 = vld [vmem:[#allocation10] sm:$0xff]  }
 0x147   :  { %723 = vmatpush1.bf16.msra.mxu0 %v1320_v25  ;;  %v280_v33 = vpack.c.bf16 %v276_v30, %v272_v26  ;;  %v1387_v25 = vld [vmem:[#allocation10 + $0x30] sm:$0xff]   ;;  %v1388_v26 = vld [vmem:[#allocation10 + $0x38] sm:$0xff]  }
 0x148   :  { %724 = vmatprep.subr.bf16.mxu0 %v1325_v28  ;;  %v1156_v28 = vld [vmem:[%s1715_s6] ss:$0 sm:$0xff]  ;;  %s1499_s6 = scalar_lea.vmem %s1068_s1, 256 }
 0x149   :  { %752 = vmatprep.mubr.bf16.mxu0 %v280_v33  ;;  %p1500_p12 = scmp.ne.s32.totalorder %s1068_s1, %s1499_s6  ;;  %p1505_p0 = scmp.lt.s32.totalorder %s1499_s6, %s1499_s6 }
 0x14b   :  { %725 = vmatpush1.bf16.msra.mxu0 %v1323_v32  ;;  %p1506_p1 = por %p1505_p0, %p1504_p13 }
 0x14c   :  { %726 = vmatprep.subr.bf16.mxu0 %v1328_v34 }
 0x14d   :  { %p1507_p2 = pnand %p1506_p1, %p1500_p12 }
 0x14f   :  { %727 = vmatpush1.bf16.msra.mxu0 %v1326_v35 }
 0x150   :  { %728 = vmatprep.subr.bf16.mxu0 %v1331_v36 }
 0x153   :  { %729 = vmatpush1.bf16.msra.mxu0 %v1329_v37 }
 0x154   :  { %730 = vmatprep.subr.bf16.mxu0 %v1334_v38 }
 0x157   :  { %731 = vmatpush1.bf16.msra.mxu0 %v1332_v39  ;;  %v1173_v39 = vld [vmem:[%s1717_s8] ss:$0 sm:$0xff] }
 0x158   :  { %732 = vmatprep.subr.bf16.mxu0 %v1337_v40 }
 0x15b   :  { %733 = vmatpush1.bf16.msra.mxu0 %v1335_v41 }
 0x15c   :  { %734 = vmatprep.subr.bf16.mxu0 %v1340_v42 }
 0x15f   :  { %735 = vmatpush1.bf16.msra.mxu0 %v1338_v43 }
 0x160   :  { %736 = vmatprep.subr.bf16.mxu0 %v1343_v44 }
 0x163   :  { %737 = vmatpush1.bf16.msra.mxu0 %v1341_v45 }
 0x164   :  { %738 = vmatprep.subr.bf16.mxu0 %v1346_v46 }
 0x167   :  { %739 = vmatpush1.bf16.msra.mxu0 %v1344_v47 }
 0x168   :  { %740 = vmatprep.subr.bf16.mxu0 %v1349_v48 }
 0x16b   :  { %741 = vmatpush1.bf16.msra.mxu0 %v1347_v49 }
 0x16c   :  { %742 = vmatprep.subr.bf16.mxu0 %v1352_v50 }
 0x16f   :  { %743 = vmatpush1.bf16.msra.mxu0 %v1350_v51 }
 0x170   :  { %744 = vmatprep.subr.bf16.mxu0 %v1355_v52 }
 0x173   :  { %745 = vmatpush1.bf16.msra.mxu0 %v1353_v53 }
 0x174   :  { %746 = vmatprep.subr.bf16.mxu0 %v1358_v54 }
 0x177   :  { %747 = vmatpush1.bf16.msra.mxu0 %v1356_v57 }
 0x178   :  { %748 = vmatprep.subr.bf16.mxu0 %v1361_v59 }
 0x17b   :  { %749 = vmatpush1.bf16.msra.mxu0 %v1359_v60 }
 0x17c   :  { %750 = vmatprep.subr.bf16.mxu0 %v1364_v61 }
 0x17f   :  { %751 = vmatpush1.bf16.msra.mxu0 %v1362_v62 }
 0x182   :  { %753 = vmatmul.mubr.bf16.vlgmr.msra.gmra.mrb[0].mxu0 %v279_v31 }
 0x255   :  { %v754_v8 = vpop.f32.mrb[0].mxu0 }
 0x256   :  { %v1233_v9 = vadd.f32 %v754_v8, %v350_v6  ;;  %v756_v10 = vpop.f32.mrb[1].mxu0 }
 0x257   :  { %v1234_v11 = vadd.f32 %v756_v10, %v354_v7  ;;  %v758_v12 = vpop.f32.mrb[2].mxu0 }
 0x258   :  { %v1235_v13 = vadd.f32 %v758_v12, %v350_v6  ;;  %v760_v14 = vpop.f32.mrb[3].mxu0  ;;  %v763_v16 = vmax.f32 %v1233_v9, 0.0 }
 0x259   :  { %v1236_v15 = vadd.f32 %v760_v14, %v354_v7  ;;  %v764_v18 = vmax.f32 %v1234_v11, 0.0 }
 0x25a   :  { %v765_v17 = vmax.f32 %v1235_v13, 0.0 }
 0x25b   :  { %v766_v19 = vmax.f32 %v1236_v15, 0.0 }
 0x25c   :  { %v767_v20 = vpack.c.bf16 %v765_v17, %v763_v16 }
 0x25d   :  { %v768_v21 = vpack.c.bf16 %v766_v19, %v764_v18 }
 0x25f   :  { %936 = vmatprep.mubr.bf16.mxu1 %v768_v21 }
 0x260   :  { %937 = vmatmul.mubr.bf16.vlgmr.msra.gmra.mrb[8].mxu1 %v767_v20 }
 0x261   :  { %1214 = vmatpush3.bf16.msra.mxu1 %v1381_v22  ;;  %1229 = vmatprep.mubr.msk.bf16.mxu1 %vm1542_vm1, %v1541_v4 }
 0x262   :  { %1215 = vmatprep.subr.bf16.mxu1 %v1541_v4 }
 0x265   :  { %1216 = vmatpush3.bf16.msra.mxu1 %v1382_v55 }
 0x266   :  { %1217 = vmatprep.subr.bf16.mxu1 %v1541_v4 }
 0x269   :  { %1218 = vmatpush3.bf16.msra.mxu1 %v1383_v56 }
 0x26a   :  { %1219 = vmatprep.subr.bf16.mxu1 %v1541_v4 }
 0x26d   :  { %1220 = vmatpush3.bf16.msra.mxu1 %v1384_v58 }
 0x26e   :  { %1221 = vmatprep.subr.bf16.mxu1 %v1541_v4 }
 0x271   :  { %1222 = vmatpush3.bf16.msra.mxu1 %v1385_v23 }
 0x272   :  { %1223 = vmatprep.subr.bf16.mxu1 %v1541_v4 }
 0x275   :  { %1224 = vmatpush3.bf16.msra.mxu1 %v1386_v24 }
 0x276   :  { %1225 = vmatprep.subr.bf16.mxu1 %v1541_v4 }
 0x279   :  { %1226 = vmatpush3.bf16.msra.mxu1 %v1387_v25 }
 0x27a   :  { %1227 = vmatprep.subr.bf16.mxu1 %v1541_v4 }
 0x27d   :  { %1228 = vmatpush3.bf16.msra.mxu1 %v1388_v26 }
 0x333   :  { %v1198_v27 = vpop.f32.mrb[8].mxu1 }
 0x334   :  { %v1199_v29 = vpop.f32.mrb[9].mxu1 }
 0x335   :  { %v1200_v30 = vadd.f32 %v1199_v29, %v1198_v27  ;;  %v1201_v31 = vpop.f32.mrb[10].mxu1 }
 0x336   :  { %v1202_v32 = vpop.f32.mrb[11].mxu1 }
 0x337   :  { %v939_v33 = vadd.f32 %v1200_v30, %v1156_v28  ;;  %v1203_v34 = vadd.f32 %v1202_v32, %v1201_v31 }
 0x339   :  { %v942_v35 = vadd.f32 %v1203_v34, %v1156_v28  ;;  %v945_v36 = vmax.f32 %v939_v33, 0.0 }
 0x33b   :  { %v946_v37 = vmax.f32 %v942_v35, 0.0 }
 0x33d   :  { %v947_v38 = vpack.c.bf16 %v946_v37, %v945_v36 }
 0x33f   :  { %1230 = vmatmul.mubr.bf16.vlgmr.msra.gmra.mrb[12].mxu1 %v947_v38 }
 0x412   :  { %v1053_v40 = vpop.f32.mrb[12].mxu1 }
 0x413   :  { %v1054_v41 = vadd.f32 %v1173_v39, %v1053_v40  ;;  %v1231_v42 = vpop.f32.mrb[13].mxu1 }
 0x414   :  { %v1056_v43 = vpop.f32.mrb[14].mxu1 }
 0x415   :  { %1060 = vst [vmem:[#allocation11] sm:$0xff] %v1054_v41  ;;  %v1057_v44 = vadd.f32 %v1173_v39, %v1056_v43  ;;  %v1232_v45 = vpop.f32.mrb[15].mxu1 }
 0x417   :  { %1061 = vst [vmem:[#allocation11 + $0x8] sm:$0xff] %v1057_v44 }
 0x418   :  { %1510 = shalt.err (!%p1507_p2)
}
 0x419   :  { %s1511_s16 = scalar_lea.hbm %s1718_s9, 256 }
 0x41a   :  { %p1512_p3 = scmp.ne.s32.totalorder %s1718_s9, %s1511_s16  ;;  %p1515_p4 = scmp.lt.u32.totalorder %s1511_s16, %s1718_s9 }
 0x41c   :  { %p1517_p5 = pnand %p1515_p4, %p1512_p3 }
 0x41e   :  { %1520 = shalt.err (!%p1517_p5)
}
 0x41f   :  { %1073 = dma.vmem_to_hbm [thread:$0]  %s1068_s1, 256, %s1718_s9, [#allocation4], %s1537_s0, %s1537_s0, %s1538_s26  }
 0x420   :  { %1527 = dma.done.wait [#allocation4], 256  }
 0x421   :  { %1528 = vsyncadd [#allocation4], 4294967040 }
 0x422   :  { %1077 = vsyncpa [#allocation3], 1 }
 0x423   :  { %1078 = vsyncpa [#allocation6], 1 }
 0x424   :  { %1079 = vsyncpa [#allocation9], 1 }
 0x425   :  { %1080 = vsyncpa [#allocation4], 1 }

</bundles_post_ra>
